<compile_context>
chip_gen: v6e
topology: v6e:2x2x1
jax: 0.10.0
libtpu: 0.0.40
codegen_flags: <defaults>
</compile_context>

<pallas_src>
import functools

import jax
import jax.numpy as jnp
from jax.experimental import pallas as pl
from jax.experimental.pallas import tpu as pltpu


def _kd_kernel(x_ref, t_ref, lbl_ref, out_ref, *, alpha, temp, chunk, num_chunks):
    """One batch tile: emit the weighted, un-normalized partial loss."""
    lbl = lbl_ref[...]                                     # (TB, 1) int32
    tb = x_ref.shape[0]
    inv_t = 1.0 / temp                                     # python const, baked in

    zeros = jnp.zeros((tb, 1), jnp.float32)
    ninf = jnp.full((tb, 1), -jnp.inf, jnp.float32)
    # carries:  mx, sx, sX, mt, st, sd, xsel   (all (TB, 1) f32)
    #   mx  = running max of x/T            sx = Σ e^{x/T − mx}
    #   sX  = Σ e^{x − T·mx}   (CE path, reuses the student max: max(x)=T·mx)
    #   mt  = running max of t/T            st = Σ e^{t/T − mt}
    #   sd  = Σ e^{t/T − mt} · (t − x)/T
    #   xsel= x[label]
    init = (ninf, zeros, zeros, ninf, zeros, zeros, zeros)

    def update(carry, x_c, t_c, col0):
        mx, sx, sX, mt, st, sd, xsel = carry
        xs = x_c * inv_t
        ts = t_c * inv_t
        d = ts - xs                                        # (t − x)/T, shift-free

        # --- student logsumexp(x/T) and logsumexp(x), sharing one max ---
        mx_new = jnp.maximum(mx, jnp.max(xs, axis=1, keepdims=True))
        ax = jnp.exp(mx - mx_new)
        sx = ax * sx + jnp.sum(jnp.exp(xs - mx_new), axis=1, keepdims=True)
        aX = jnp.exp(temp * (mx - mx_new))
        sX = aX * sX + jnp.sum(jnp.exp(temp * (xs - mx_new)), axis=1, keepdims=True)

        # --- teacher logsumexp(t/T) and Σ q·(ts − xs) numerator ---
        mt_new = jnp.maximum(mt, jnp.max(ts, axis=1, keepdims=True))
        at = jnp.exp(mt - mt_new)
        et = jnp.exp(ts - mt_new)
        st = at * st + jnp.sum(et, axis=1, keepdims=True)
        sd = at * sd + jnp.sum(et * d, axis=1, keepdims=True)

        # --- CE label select on the raw logit (no full log-softmax) ---
        cls = col0 + jax.lax.broadcasted_iota(jnp.int32, x_c.shape, 1)
        xsel = xsel + jnp.sum(jnp.where(cls == lbl, x_c, 0.0), axis=1, keepdims=True)
        return (mx_new, sx, sX, mt_new, st, sd, xsel)

    if num_chunks == 1:
        carry = update(init,
                       x_ref[...].astype(jnp.float32),
                       t_ref[...].astype(jnp.float32),
                       0)
    else:
        def body(i, carry):
            start = pl.multiple_of(i * chunk, chunk)
            x_c = x_ref[:, pl.ds(start, chunk)].astype(jnp.float32)
            t_c = t_ref[:, pl.ds(start, chunk)].astype(jnp.float32)
            return update(carry, x_c, t_c, i * chunk)
        carry = jax.lax.fori_loop(0, num_chunks, body, init,
                                  unroll=(num_chunks <= 8))

    mx, sx, sX, mt, st, sd, xsel = carry

    # KL rows: Σ q·(ts − xs) + lse(x/T) − lse(t/T)
    kl = jnp.sum(sd / st + (mx + jnp.log(sx)) - (mt + jnp.log(st)))
    # CE rows: logsumexp(x) − x[label] = T·mx + log sX − x[label]
    ce = jnp.sum(temp * mx + jnp.log(sX) - xsel)

    combined = kl * (alpha * temp * temp) + ce * (1.0 - alpha)

    # Lane-dense (8,128) unmasked store of the per-tile partial.
    out_ref[...] = jnp.full(out_ref.shape, combined, dtype=jnp.float32)


def _tpu_vmem_limit_bytes():
    """Explicit scoped-VMEM limit, generation-aware with a v7x-safe fallback."""
    try:
        cap = int(pltpu.get_tpu_info().vmem_capacity_bytes)
    except Exception:
        cap = 64 << 20                      # conservative: v7x physical per-TC VMEM
    return int(min(cap * 3 // 4, 96 << 20))  # 96 MiB on 128 MiB chips, 48 MiB on v7x


def _pick_class_chunk(C):
    """Chunk the class axis only when it is large and 128-lane aligned."""
    if C <= 2048:
        return C
    for ck in (2048, 1024, 512, 256, 128):
        if C % ck == 0:
            return ck
    return C


def _pick_batch_tile(B, bytes_per_row, vmem_limit_bytes):
    """Largest batch tile dividing B whose full VMEM footprint (double-buffered
    DMA blocks + in-kernel f32 intermediates) fits ~70% of the scoped limit,
    preferring >=2 grid steps so both v7x TensorCores get work."""
    budget = int(0.70 * vmem_limit_bytes)
    tb_cap = max(budget // max(bytes_per_row, 1), 1)
    cands = [tb for tb in (2048, 1024, 512, 256, 128, 64, 32, 16)
             if tb <= tb_cap and B % tb == 0]
    for tb in cands:                         # prefer G >= 2 (megacore / 2-TC v7x)
        if B // tb >= 2:
            return tb
    if cands:
        return cands[0]
    if B <= tb_cap:
        return B
    # TODO(synk): for vocab-sized C even a 16-row tile overshoots the budget;
    # the class axis would also need grid-level tiling of the DMA blocks.
    for tb in (16, 8):
        if B % tb == 0:
            return tb
    return B


def kd_loss(student_logits, teacher_logits, labels, *, alpha, temp, class_chunk=None):
    """student_logits/teacher_logits: [B, C]; labels: [B] int (class indices)."""
    B, C = student_logits.shape

    # Stream logits in their native width; an explicit f32->bf16 cast in the
    # wrapper would add a full extra HBM pass.
    x = student_logits
    t = teacher_logits
    if x.dtype not in (jnp.float32, jnp.bfloat16):
        x = x.astype(jnp.float32)
    if t.dtype not in (jnp.float32, jnp.bfloat16):
        t = t.astype(jnp.float32)
    lbl = labels.astype(jnp.int32).reshape(B, 1)

    chunk = class_chunk if class_chunk is not None else _pick_class_chunk(C)
    if C % chunk != 0:
        chunk = C
    num_chunks = C // chunk

    vmem_limit = _tpu_vmem_limit_bytes()
    # 2 pipeline buffers per input (native dtype) + ~8 live (TB, chunk) f32 temps.
    bytes_per_row = 2 * C * (x.dtype.itemsize + t.dtype.itemsize) + 8 * chunk * 4
    TB = _pick_batch_tile(B, bytes_per_row, vmem_limit)
    G = B // TB

    kernel = functools.partial(_kd_kernel, alpha=float(alpha), temp=float(temp),
                               chunk=chunk, num_chunks=num_chunks)
    partials = pl.pallas_call(
        kernel,
        out_shape=jax.ShapeDtypeStruct((G, 8, 128), jnp.float32),
        grid=(G,),
        in_specs=[
            pl.BlockSpec((TB, C), lambda i: (i, 0)),
            pl.BlockSpec((TB, C), lambda i: (i, 0)),
            pl.BlockSpec((TB, 1), lambda i: (i, 0)),
        ],
        out_specs=pl.BlockSpec((1, 8, 128), lambda i: (i, 0, 0)),
        compiler_params=pltpu.CompilerParams(
            dimension_semantics=("parallel",),
            vmem_limit_bytes=vmem_limit),
    )(x, t, lbl)

    # Both KLDiv (batchmean) and CE (mean) normalize by B; both terms are linear.
    return jnp.sum(partials[:, 0, 0]) / B


def _kd_loss_ref(student_logits, teacher_logits, labels, *, alpha, temp):
    x = student_logits.astype(jnp.float32)
    t = teacher_logits.astype(jnp.float32)
    B, _ = x.shape
    log_p = jax.nn.log_softmax(x / temp, axis=1)
    q = jax.nn.softmax(t / temp, axis=1)
    kl = jnp.sum(q * (jnp.log(q) - log_p)) / B
    log_px = jax.nn.log_softmax(x, axis=1)
    ce = -jnp.mean(jnp.take_along_axis(log_px, labels[:, None].astype(jnp.int32), axis=1))
    return kl * (alpha * temp * temp) + ce * (1.0 - alpha)


if __name__ == "__main__":
    key = jax.random.PRNGKey(0)
    alpha, T = 0.5, 4.0

    # Case 1: small classifier head (single class chunk, no in-kernel loop).
    k1, k2, k3 = jax.random.split(jax.random.fold_in(key, 0), 3)
    B, C = 8, 32
    student = jax.random.normal(k1, (B, C), dtype=jnp.float32)
    teacher = jax.random.normal(k2, (B, C), dtype=jnp.float32)
    labels = jax.random.randint(k3, (B,), 0, C, dtype=jnp.int32)
    loss = kd_loss(student, teacher, labels, alpha=alpha, temp=T)
    jax.block_until_ready(loss)
    ref = _kd_loss_ref(student, teacher, labels, alpha=alpha, temp=T)
    assert jnp.allclose(loss, ref, rtol=2e-3, atol=1e-3), (loss, ref)

    # Case 2: exercise the online class-chunked path (2 chunks of 128 lanes).
    k1, k2, k3 = jax.random.split(jax.random.fold_in(key, 1), 3)
    B, C = 16, 256
    student = jax.random.normal(k1, (B, C), dtype=jnp.float32)
    teacher = jax.random.normal(k2, (B, C), dtype=jnp.float32)
    labels = jax.random.randint(k3, (B,), 0, C, dtype=jnp.int32)
    loss = kd_loss(student, teacher, labels, alpha=alpha, temp=T, class_chunk=128)
    jax.block_until_ready(loss)
    ref = _kd_loss_ref(student, teacher, labels, alpha=alpha, temp=T)
    assert jnp.allclose(loss, ref, rtol=2e-3, atol=1e-3), (loss, ref)

    print("KERNEL_OK")
</pallas_src>

<mosaic_0001>
module attributes {stable_mosaic.version = 11 : i64} {
  func.func @_kd_kernel(%arg0: i32, %arg1: memref<8x32xf32, #tpu.memory_space<vmem>>, %arg2: memref<8x32xf32, #tpu.memory_space<vmem>>, %arg3: memref<8x1xi32, #tpu.memory_space<vmem>>, %arg4: memref<1x8x128xf32, #tpu.memory_space<vmem>>) attributes {dimension_semantics = [#tpu.dimension_semantics<parallel>], iteration_bounds = array<i64: 1>, scalar_prefetch = 0 : i64, scratch_operands = 0 : i64, tpu.core_type = #tpu.core_type<tc>, window_params = [{transform_indices = @transform_0, window_bounds = array<i64: 8, 32>}, {transform_indices = @transform_1, window_bounds = array<i64: 8, 32>}, {transform_indices = @transform_2, window_bounds = array<i64: 8, 1>}, {transform_indices = @transform_3, window_bounds = array<i64: 1, 8, 128>}]} {
    %c0 = arith.constant 0 : index
    %c0_0 = arith.constant 0 : index
    %0 = vector.load %arg3[%c0, %c0_0] : memref<8x1xi32, #tpu.memory_space<vmem>>, vector<8x1xi32>
    %cst = arith.constant 0.000000e+00 : f32
    %1 = vector.broadcast %cst : f32 to vector<8x1xf32>
    %cst_1 = arith.constant 0xFF800000 : f32
    %2 = vector.broadcast %cst_1 : f32 to vector<8x1xf32>
    %c0_2 = arith.constant 0 : index
    %c0_3 = arith.constant 0 : index
    %3 = vector.load %arg1[%c0_2, %c0_3] : memref<8x32xf32, #tpu.memory_space<vmem>>, vector<8x32xf32>
    %c0_4 = arith.constant 0 : index
    %c0_5 = arith.constant 0 : index
    %4 = vector.load %arg2[%c0_4, %c0_5] : memref<8x32xf32, #tpu.memory_space<vmem>>, vector<8x32xf32>
    %cst_6 = arith.constant 2.500000e-01 : f32
    %5 = vector.broadcast %cst_6 : f32 to vector<8x32xf32>
    %6 = arith.mulf %3, %5 : vector<8x32xf32>
    %cst_7 = arith.constant 2.500000e-01 : f32
    %7 = vector.broadcast %cst_7 : f32 to vector<8x32xf32>
    %8 = arith.mulf %4, %7 : vector<8x32xf32>
    %9 = arith.subf %8, %6 : vector<8x32xf32>
    %cst_8 = arith.constant dense<0xFF800000> : vector<8xf32>
    %10 = vector.multi_reduction <maximumf>, %6, %cst_8 [1] : vector<8x32xf32> to vector<8xf32>
    %11 = vector.shape_cast %10 : vector<8xf32> to vector<8x1xf32>
    %12 = arith.maximumf %2, %11 : vector<8x1xf32>
    %13 = arith.subf %2, %12 : vector<8x1xf32>
    %14 = math.exp %13 : vector<8x1xf32>
    %15 = arith.mulf %14, %1 : vector<8x1xf32>
    %16 = vector.broadcast %12 : vector<8x1xf32> to vector<8x32xf32>
    %17 = arith.subf %6, %16 : vector<8x32xf32>
    %18 = math.exp %17 : vector<8x32xf32>
    %cst_9 = arith.constant dense<0.000000e+00> : vector<8xf32>
    %19 = vector.multi_reduction <add>, %18, %cst_9 [1] : vector<8x32xf32> to vector<8xf32>
    %20 = vector.shape_cast %19 : vector<8xf32> to vector<8x1xf32>
    %21 = arith.addf %15, %20 : vector<8x1xf32>
    %22 = arith.subf %2, %12 : vector<8x1xf32>
    %cst_10 = arith.constant 4.000000e+00 : f32
    %23 = vector.broadcast %cst_10 : f32 to vector<8x1xf32>
    %24 = arith.mulf %23, %22 : vector<8x1xf32>
    %25 = math.exp %24 : vector<8x1xf32>
    %26 = arith.mulf %25, %1 : vector<8x1xf32>
    %27 = vector.broadcast %12 : vector<8x1xf32> to vector<8x32xf32>
    %28 = arith.subf %6, %27 : vector<8x32xf32>
    %cst_11 = arith.constant 4.000000e+00 : f32
    %29 = vector.broadcast %cst_11 : f32 to vector<8x32xf32>
    %30 = arith.mulf %29, %28 : vector<8x32xf32>
    %31 = math.exp %30 : vector<8x32xf32>
    %cst_12 = arith.constant dense<0.000000e+00> : vector<8xf32>
    %32 = vector.multi_reduction <add>, %31, %cst_12 [1] : vector<8x32xf32> to vector<8xf32>
    %33 = vector.shape_cast %32 : vector<8xf32> to vector<8x1xf32>
    %34 = arith.addf %26, %33 : vector<8x1xf32>
    %cst_13 = arith.constant dense<0xFF800000> : vector<8xf32>
    %35 = vector.multi_reduction <maximumf>, %8, %cst_13 [1] : vector<8x32xf32> to vector<8xf32>
    %36 = vector.shape_cast %35 : vector<8xf32> to vector<8x1xf32>
    %37 = arith.maximumf %2, %36 : vector<8x1xf32>
    %38 = arith.subf %2, %37 : vector<8x1xf32>
    %39 = math.exp %38 : vector<8x1xf32>
    %40 = vector.broadcast %37 : vector<8x1xf32> to vector<8x32xf32>
    %41 = arith.subf %8, %40 : vector<8x32xf32>
    %42 = math.exp %41 : vector<8x32xf32>
    %43 = arith.mulf %39, %1 : vector<8x1xf32>
    %cst_14 = arith.constant dense<0.000000e+00> : vector<8xf32>
    %44 = vector.multi_reduction <add>, %42, %cst_14 [1] : vector<8x32xf32> to vector<8xf32>
    %45 = vector.shape_cast %44 : vector<8xf32> to vector<8x1xf32>
    %46 = arith.addf %43, %45 : vector<8x1xf32>
    %47 = arith.mulf %39, %1 : vector<8x1xf32>
    %48 = arith.mulf %42, %9 : vector<8x32xf32>
    %cst_15 = arith.constant dense<0.000000e+00> : vector<8xf32>
    %49 = vector.multi_reduction <add>, %48, %cst_15 [1] : vector<8x32xf32> to vector<8xf32>
    %50 = vector.shape_cast %49 : vector<8xf32> to vector<8x1xf32>
    %51 = arith.addf %47, %50 : vector<8x1xf32>
    %52 = tpu.iota {dimensions = array<i32: 1>} : vector<8x32xi32>
    %c0_i32 = arith.constant 0 : i32
    %53 = vector.broadcast %c0_i32 : i32 to vector<8x32xi32>
    %54 = arith.addi %53, %52 : vector<8x32xi32>
    %55 = vector.broadcast %0 : vector<8x1xi32> to vector<8x32xi32>
    %56 = arith.cmpi eq, %54, %55 : vector<8x32xi32>
    %cst_16 = arith.constant 0.000000e+00 : f32
    %57 = vector.broadcast %cst_16 : f32 to vector<8x32xf32>
    %58 = arith.select %56, %3, %57 : vector<8x32xi1>, vector<8x32xf32>
    %cst_17 = arith.constant dense<0.000000e+00> : vector<8xf32>
    %59 = vector.multi_reduction <add>, %58, %cst_17 [1] : vector<8x32xf32> to vector<8xf32>
    %60 = vector.shape_cast %59 : vector<8xf32> to vector<8x1xf32>
    %61 = arith.addf %1, %60 : vector<8x1xf32>
    %62 = arith.divf %51, %46 : vector<8x1xf32>
    %63 = math.log %21 : vector<8x1xf32>
    %64 = arith.addf %12, %63 : vector<8x1xf32>
    %65 = arith.addf %62, %64 : vector<8x1xf32>
    %66 = math.log %46 : vector<8x1xf32>
    %67 = arith.addf %37, %66 : vector<8x1xf32>
    %68 = arith.subf %65, %67 : vector<8x1xf32>
    %69 = vector.shape_cast %68 : vector<8x1xf32> to vector<1x8x1xf32>
    %cst_18 = arith.constant dense<0.000000e+00> : vector<1xf32>
    %70 = vector.multi_reduction <add>, %69, %cst_18 [1, 2] : vector<1x8x1xf32> to vector<1xf32>
    %71 = vector.shape_cast %70 : vector<1xf32> to vector<1x1x1xf32>
    %72 = vector.extract %71[0, 0, 0] : f32 from vector<1x1x1xf32>
    %cst_19 = arith.constant 4.000000e+00 : f32
    %73 = vector.broadcast %cst_19 : f32 to vector<8x1xf32>
    %74 = arith.mulf %73, %12 : vector<8x1xf32>
    %75 = math.log %34 : vector<8x1xf32>
    %76 = arith.addf %74, %75 : vector<8x1xf32>
    %77 = arith.subf %76, %61 : vector<8x1xf32>
    %78 = vector.shape_cast %77 : vector<8x1xf32> to vector<1x8x1xf32>
    %cst_20 = arith.constant dense<0.000000e+00> : vector<1xf32>
    %79 = vector.multi_reduction <add>, %78, %cst_20 [1, 2] : vector<1x8x1xf32> to vector<1xf32>
    %80 = vector.shape_cast %79 : vector<1xf32> to vector<1x1x1xf32>
    %81 = vector.extract %80[0, 0, 0] : f32 from vector<1x1x1xf32>
    %cst_21 = arith.constant 8.000000e+00 : f32
    %82 = arith.mulf %72, %cst_21 : f32
    %cst_22 = arith.constant 5.000000e-01 : f32
    %83 = arith.mulf %81, %cst_22 : f32
    %84 = arith.addf %82, %83 : f32
    %85 = vector.broadcast %84 : f32 to vector<1x8x128xf32>
    %c0_23 = arith.constant 0 : index
    %c0_24 = arith.constant 0 : index
    %c0_25 = arith.constant 0 : index
    %86 = vector.load %arg4[%c0_23, %c0_24, %c0_25] : memref<1x8x128xf32, #tpu.memory_space<vmem>>, vector<1x8x128xf32>
    tpu.vector_store %arg4[%c0_23, %c0_24, %c0_25], %85 {strides = array<i32>} : memref<1x8x128xf32, #tpu.memory_space<vmem>>, vector<1x8x128xf32>,
    return
  }
  func.func @transform_0(%arg0: i32) -> (i32, i32) {
    %c0_i32 = arith.constant 0 : i32
    %c0_i32_0 = arith.constant 0 : i32
    return %arg0, %c0_i32 : i32, i32
  }
  func.func @transform_1(%arg0: i32) -> (i32, i32) {
    %c0_i32 = arith.constant 0 : i32
    %c0_i32_0 = arith.constant 0 : i32
    return %arg0, %c0_i32 : i32, i32
  }
  func.func @transform_2(%arg0: i32) -> (i32, i32) {
    %c0_i32 = arith.constant 0 : i32
    %c0_i32_0 = arith.constant 0 : i32
    return %arg0, %c0_i32 : i32, i32
  }
  func.func @transform_3(%arg0: i32) -> (i32, i32, i32) {
    %c0_i32 = arith.constant 0 : i32
    %c0_i32_0 = arith.constant 0 : i32
    %c0_i32_1 = arith.constant 0 : i32
    return %arg0, %c0_i32, %c0_i32_0 : i32, i32, i32
  }
}

</mosaic_0001>

<bundles_post_ra>
// kernel: tpu_custom_call.1
= control target key start
LH: loop header
LB: loop body
LE: loop exit
PB: predicated region body
PF: predicated region fallthrough
CT: control target
= control target key end

     0   :  { %8 = vsyncpa [#allocation3], 0  ;;  %s271_s0 = inlined_call_operand.vmem [shape: f32[8,32], index: 0, kind: input, shape index: {}]   ;;  %s272_s1 = inlined_call_operand.hbm [shape: f32[8,32], index: 1, kind: input, shape index: {}]   ;;  %s273_s2 = inlined_call_operand.vmem [shape: s32[8,1], index: 2, kind: input, shape index: {}]   ;;  %s274_s3 = inlined_call_operand.hbm [shape: f32[1,8,128], index: 3, kind: output, shape index: {}]  }
   0x1   :  { %9 = vsyncpa [#allocation4], 0  ;;  %s218_s12 = smov [#allocation2]  }
   0x2   :  { %s18_s13 = sshll.u32 %s218_s12, 4  ;;  %s19_s13 = int_to_ptr.vmem [resolvable:$true] %s18_s13 }
   0x3   :  { %s182_s14 = scalar_lea.vmem %s19_s13, 128  ;;  %p187_p1 = scmp.lt.s32.totalorder %s19_s13, %s19_s13 }
   0x4   :  { %p183_p0 = scmp.ne.s32.totalorder %s19_s13, %s182_s14  ;;  %p188_p2 = scmp.lt.s32.totalorder %s182_s14, %s182_s14 }
   0x6   :  { %p189_p3 = por %p188_p2, %p187_p1 }
   0x8   :  { %p190_p4 = pnand %p189_p3, %p183_p0 }
   0xa   :  { %193 = shalt.err (!%p190_p4)
}
   0xb   :  { %21 = dma.hbm_to_vmem [thread:$0]  %s272_s1, 128, %s19_s13, [#allocation3]  }
   0xc   :  { %214 = dma.done.wait [#allocation3], 128  }
   0xd   :  { %215 = vsyncadd [#allocation3], 4294967168  ;;  %v219_v0 = vmov 0   ;;  %v28_v1 = vld [vmem:[%s271_s0] sm:$0xff]  ;;  %vm33_vm0 = vcmask 261120   ;;  %v78_v16 = vlaneseq  ;;  %vm99_vm2 = vcmask 7168  }
   0xe   :  { %152 = vset.pattern.permute.xlu1 %v219_v0  ;;  %153 = vset.pattern.permute.xlu0 %v219_v0  ;;  %v29_v2 = vld [vmem:[#allocation2] sm:$0xff]  ;;  %v30_v4 = vmul.f32 0.25, %v28_v1  ;;  %s220_s22 = smov [#allocation5]  }
   0xf   :  { %v27_v3 = vld [vmem:[%s273_s2] sm:$0xff]  ;;  %v31_v5 = vmul.f32 0.25, %v29_v2  ;;  %v79_v22 = vand.u32 127, %v78_v16  ;;  %s136_s23 = sshll.u32 %s220_s22, 4  ;;  %s137_s23 = int_to_ptr.vmem [resolvable:$true] %s136_s23 }
  0x10   :  { %81 = vperm.xlu1 %152, %v27_v3   ;;  %v34_v6 = vsel %vm33_vm0, %v30_v4, -inf  ;;  %s194_s25 = scalar_lea.vmem %s137_s23, 128  ;;  %p199_p6 = scmp.lt.s32.totalorder %s137_s23, %s137_s23 }
  0x11   :  { %35 = vmax.xlane.f32.xlu0 %v34_v6  ;;  %v59_v7 = vsel %vm33_vm0, %v31_v5, -inf  ;;  %v32_v21 = vsub.f32 %v31_v5, %v30_v4  ;;  %p195_p5 = scmp.ne.s32.totalorder %s137_s23, %s194_s25  ;;  %p200_p7 = scmp.lt.s32.totalorder %s194_s25, %s194_s25 }
  0x13   :  { %p201_p8 = por %p200_p7, %p199_p6 }
  0x15   :  { %60 = vmax.xlane.f32.xlu0 %v59_v7  ;;  %p202_p9 = pnand %p201_p8, %p195_p5 }
  0x8b   :  { %v82_v23 = vpop.permute.xlu1 %81 }
  0x8c   :  { %vm83_vm1 = vcmp.eq.s32.totalorder %v79_v22, %v82_v23 }
  0x8d   :  { %v84_v27 = vsel %vm83_vm1, %v28_v1, 0.0 }
  0x8e   :  { %v85_v29 = vsel %vm33_vm0, %v84_v27, 0.0 }
  0x9a   :  { %v252_v8 = vpop.xlane.xlu0 %35 }
  0x9b   :  { %v41_v9 = vsub.f32 %v30_v4, %v252_v8  ;;  %v37_v30 = vsub.f32 -inf, %v252_v8  ;;  %v110_v59 = vmul.f32 4.0, %v252_v8 }
  0x9d   :  { %v42_v10 = vmul.f32 1.442695, %v41_v9  ;;  %v52_v11 = vmul.f32 4.0, %v41_v9  ;;  %v48_v31 = vmul.f32 4.0, %v37_v30  ;;  %v38_v32 = vmul.f32 1.442695, %v37_v30 }
  0x9e   :  { %v255_v12 = vpop.xlane.xlu0 %60 }
  0x9f   :  { %154 = vpow2.f32 %v42_v10  ;;  %v53_v13 = vmul.f32 1.442695, %v52_v11  ;;  %v65_v14 = vsub.f32 %v31_v5, %v255_v12  ;;  %v62_v33 = vsub.f32 -inf, %v255_v12 }
  0xa0   :  { %v49_v34 = vmul.f32 1.442695, %v48_v31 }
  0xa1   :  { %156 = vpow2.f32 %v53_v13  ;;  %v66_v15 = vmul.f32 1.442695, %v65_v14  ;;  %v63_v35 = vmul.f32 1.442695, %v62_v33 }
  0xa3   :  { %158 = vpow2.f32 %v66_v15 }
  0xa4   :  { %160 = vpow2.f32 %v38_v32 }
  0xa5   :  { %162 = vpow2.f32 %v49_v34 }
  0xa6   :  { %164 = vpow2.f32 %v63_v35 }
  0xac   :  { %v155_v17 = vpop.eup %154 }
  0xad   :  { %v44_v18 = vsel %vm33_vm0, %v155_v17, 0.0 }
  0xae   :  { %v157_v19 = vpop.eup %156  ;;  %45 = vadd.xlane.f32.xlu1 %v44_v18 }
  0xaf   :  { %v55_v20 = vsel %vm33_vm0, %v157_v19, 0.0 }
  0xb0   :  { %56 = vadd.xlane.f32.xlu0 %v55_v20  ;;  %v159_v24 = vpop.eup %158 }
  0xb1   :  { %v69_v25 = vsel %vm33_vm0, %v159_v24, 0.0  ;;  %v73_v26 = vmul.f32 %v159_v24, %v32_v21  ;;  %v161_v36 = vpop.eup %160 }
  0xb2   :  { %v163_v37 = vpop.eup %162  ;;  %v40_v38 = vmul.f32 0.0, %v161_v36 }
  0xb3   :  { %v74_v28 = vsel %vm33_vm0, %v73_v26, 0.0  ;;  %v51_v41 = vmul.f32 0.0, %v163_v37  ;;  %v165_v42 = vpop.eup %164 }
  0xb4   :  { %70 = vadd.xlane.f32.xlu0 %v69_v25  ;;  %v68_v45 = vmul.f32 0.0, %v165_v42 }
  0xb8   :  { %75 = vadd.xlane.f32.xlu0 %v74_v28 }
  0xbc   :  { %86 = vadd.xlane.f32.xlu0 %v85_v29 }
 0x137   :  { %v46_v39 = vpop.xlane.xlu1 %45 }
 0x138   :  { %v47_v40 = vadd.f32 %v46_v39, %v40_v38 }
 0x139   :  { %v57_v43 = vpop.xlane.xlu0 %56 }
 0x13a   :  { %166 = vlog2.f32 %v47_v40  ;;  %v58_v44 = vadd.f32 %v57_v43, %v51_v41 }
 0x13c   :  { %168 = vlog2.f32 %v58_v44 }
 0x13d   :  { %v71_v46 = vpop.xlane.xlu0 %70 }
 0x13e   :  { %v72_v47 = vadd.f32 %v71_v46, %v68_v45 }
 0x140   :  { %170 = vrcp.f32 %v72_v47 }
 0x141   :  { %172 = vlog2.f32 %v72_v47  ;;  %v76_v49 = vpop.xlane.xlu0 %75 }
 0x142   :  { %v77_v52 = vadd.f32 %v76_v49, %v68_v45 }
 0x145   :  { %v87_v63 = vpop.xlane.xlu0 %86 }
 0x147   :  { %v167_v48 = vpop.eup %166 }
 0x148   :  { %v92_v51 = vmul.f32 0.6931472, %v167_v48 }
 0x149   :  { %v169_v50 = vpop.eup %168 }
 0x14a   :  { %v112_v54 = vmul.f32 0.6931472, %v169_v50  ;;  %v93_v57 = vadd.f32 %v92_v51, %v252_v8 }
 0x14c   :  { %v113_v61 = vadd.f32 %v112_v54, %v110_v59 }
 0x14d   :  { %v171_v53 = vpop.eup %170 }
 0x14e   :  { %v173_v55 = vpop.eup %172  ;;  %v90_v56 = vmul.f32 %v171_v53, %v77_v52  ;;  %v114_v1 = vsub.f32 %v113_v61, %v87_v63 }
 0x14f   :  { %v96_v58 = vmul.f32 0.6931472, %v173_v55 }
 0x150   :  { %v94_v60 = vadd.f32 %v93_v57, %v90_v56  ;;  %v115_v3 = vsel %vm99_vm2, %v114_v1, 0.0 }
 0x151   :  { %v97_v62 = vadd.f32 %v96_v58, %v255_v12 }
 0x153   :  { %v98_v0 = vsub.f32 %v94_v60, %v97_v62 }
 0x155   :  { %v100_v2 = vsel %vm99_vm2, %v98_v0, 0.0 }
 0x156   :  { %101 = vadd.xlane.f32.xlu0 %v100_v2 }
 0x15a   :  { %116 = vadd.xlane.f32.xlu0 %v115_v3 }
 0x1df   :  { %v102_v4 = vpop.xlane.xlu0 %101 }
 0x1e0   :  { %v103_v5 = vrot.slane %v102_v4, 4 }
 0x1e2   :  { %v104_v6 = vadd.f32 %v103_v5, %v102_v4 }
 0x1e3   :  { %v117_v7 = vpop.xlane.xlu0 %116 }
 0x1e4   :  { %v105_v9 = vrot.slane %v104_v6, 2  ;;  %v118_v10 = vrot.slane %v117_v7, 4 }
 0x1e6   :  { %v119_v11 = vadd.f32 %v118_v10, %v117_v7  ;;  %v106_v8 = vadd.f32 %v105_v9, %v104_v6 }
 0x1e8   :  { %v120_v13 = vrot.slane %v119_v11, 2  ;;  %v107_v14 = vrot.slane %v106_v8, 1 }
 0x1ea   :  { %v121_v15 = vadd.f32 %v120_v13, %v119_v11  ;;  %v108_v12 = vadd.f32 %v107_v14, %v106_v8 }
 0x1ec   :  { %145 = vpush %v108_v12  ;;  %v122_v16 = vrot.slane %v121_v15, 1 }
 0x1ee   :  { %v123_v17 = vadd.f32 %v122_v16, %v121_v15 }
 0x1f0   :  { %147 = vpush %v123_v17 }
 0x21d   :  { %s146_s0 = spop %145 }
 0x21e   :  { %s125_s1 = smul.f32 8.0, %s146_s0 }
 0x221   :  { %s148_s2 = spop %147 }
 0x222   :  { %s126_s21 = smul.f32 0.5, %s148_s2 }
 0x224   :  { %s127_s24 = sadd.f32 %s126_s21, %s125_s1 }
 0x226   :  { %v128_v18 = vstv %s127_s24 }
 0x227   :  { %129 = vst [vmem:[#allocation5] sm:$0xff] %v128_v18 }
 0x228   :  { %205 = shalt.err (!%p202_p9)
}
 0x229   :  { %139 = dma.vmem_to_hbm [thread:$0]  %s137_s23, 128, %s274_s3, [#allocation4]  }
 0x22a   :  { %216 = dma.done.wait [#allocation4], 128  }
 0x22b   :  { %217 = vsyncadd [#allocation4], 4294967168 }
 0x22c   :  { %143 = vsyncpa [#allocation3], 1 }
 0x22d   :  { %144 = vsyncpa [#allocation4], 1 }

</bundles_post_ra>
